<compile_context>
chip_gen: v5e
topology: v5e:2x2
jax: 0.10.0
libtpu: 0.0.40
codegen_flags: <defaults>
</compile_context>

<pallas_src>
import math
import functools

import jax
import jax.numpy as jnp
from jax.experimental import pallas as pl
from jax.experimental.pallas import tpu as pltpu


def _round_up(a, m):
    return ((a + m - 1) // m) * m


def spatial_attention_kernel(x_ref, o_ref, *, scale, n):
    # x_ref: (G, N, F_in) block of flattened (batch*time) slices, f32
    # o_ref: (G, N*N)     lane-dense attention scores for those slices
    x = x_ref[...]                                      # already f32, no cast

    # Per-slice Gram matrix. K = F_in is tiny so the MXU is mostly idle here, but
    # the kernel is HBM-writeback-bound, so this stays hidden behind the DMA.
    scores = jnp.einsum("gnf,gmf->gnm", x, x,
                        preferred_element_type=jnp.float32) * scale

    # Numerically-stable softmax over the last dim; reciprocal goes to the EUP.
    m = jnp.max(scores, axis=-1, keepdims=True)
    e = jnp.exp(scores - m)
    s = jnp.sum(e, axis=-1, keepdims=True)
    att = e * pl.reciprocal(s, approx=False)            # exact: rows sum to 1

    # Lane-dense store: collapse (N, N) onto the 128-lane axis before writing.
    g = att.shape[0]
    o_ref[...] = att.reshape(g, n * n).astype(o_ref.dtype)


def spatial_attention_pallas(x, *, out_dtype=jnp.float32,
                             vmem_block_budget_bytes=8 << 20,
                             target_grid_steps=8):
    """
    x: (B, N, T, F_in) float32
    returns: (B, T, N, N) == softmax(x_t @ x_t^T / sqrt(F_in)) per (b, t)
    """
    B, N, T, F_in = x.shape
    total = B * T

    # Fold (B, T) into one leading axis (one-time XLA layout pass) so the kernel
    # sees dense (G, N, F_in) slabs.
    x_flat = jnp.transpose(x, (0, 2, 1, 3)).reshape(total, N, F_in)

    # ---- Derive block size G from a VMEM budget. Per-slice bytes account for the
    # (8,128) tile padding, the double-buffered in/out blocks, and the fp32
    # intermediates (scores/e/att/reshape copy) live inside the kernel. ----
    out_itemsize = jnp.dtype(out_dtype).itemsize
    in_bytes = _round_up(N, 8) * _round_up(F_in, 128) * 4
    out_bytes = _round_up(N * N, 128) * out_itemsize
    inter_bytes = 4 * _round_up(N, 8) * _round_up(N, 128) * 4
    per_slice = 2 * in_bytes + 2 * out_bytes + inter_bytes

    g_budget = max(1, vmem_block_budget_bytes // per_slice)
    g_steps = max(1, -(-total // target_grid_steps))    # keep the grid long
    G = min(g_budget, g_steps)
    G = max(8, (G // 8) * 8)      # output-block sublane dim must be a multiple of 8

    total_padded = _round_up(total, G)
    if total_padded != total:
        x_flat = jnp.pad(x_flat, ((0, total_padded - total), (0, 0), (0, 0)))
    num_blocks = total_padded // G

    kernel = functools.partial(spatial_attention_kernel,
                               scale=1.0 / math.sqrt(F_in), n=N)

    out = pl.pallas_call(
        kernel,
        out_shape=jax.ShapeDtypeStruct((total_padded, N * N), out_dtype),
        grid_spec=pltpu.PrefetchScalarGridSpec(
            num_scalar_prefetch=0,
            grid=(num_blocks,),
            in_specs=[
                # Last two dims equal the full array dims -> satisfies (8,128) rule.
                pl.BlockSpec((G, N, F_in), lambda i: (i, 0, 0)),
            ],
            # Lane-dense output block: wide unmasked stores, no N<128 inflation.
            out_specs=pl.BlockSpec((G, N * N), lambda i: (i, 0)),
        ),
        compiler_params=pltpu.CompilerParams(
            # v7x shards the grid axis across its two TensorCores; on single-TC
            # v5e/v6e this annotation is neutral and the grid length is chosen
            # purely for pipelining depth / VMEM fit.
            dimension_semantics=("parallel",),
            vmem_limit_bytes=32 << 20,
        ),
    )(x_flat)

    # Drop padded slices; (total, N*N) -> (B, T, N, N) is a free row-major reshape.
    return out[:total].reshape(B, T, N, N)


def spatial_attention_reference(x):
    B, N, T, F_in = x.shape
    xp = jnp.transpose(x, (0, 2, 1, 3))                       # (B, T, N, F_in)
    scores = jnp.einsum("btnf,btmf->btnm", xp, xp) / math.sqrt(F_in)
    return jax.nn.softmax(scores, axis=-1)                    # (B, T, N, N)


if __name__ == "__main__":
    # Small shapes consistent with the module's forward: x (batch, N, T, F_in)
    B, N, T, F_in = 2, 16, 8, 4

    key = jax.random.PRNGKey(0)
    x = jax.random.normal(key, (B, N, T, F_in), dtype=jnp.float32)

    out = spatial_attention_pallas(x)
    out = jax.block_until_ready(out)

    ref = spatial_attention_reference(x)
    assert out.shape == (B, T, N, N)
    assert jnp.allclose(out, ref, atol=1e-4, rtol=1e-4), "mismatch vs reference"
    # Rows of a softmax sum to 1.
    assert jnp.allclose(jnp.sum(out, axis=-1), 1.0, atol=1e-4)

    print("KERNEL_OK")
</pallas_src>

<mosaic_0001>
module attributes {stable_mosaic.version = 11 : i64} {
  func.func @spatial_attention_kernel(%arg0: i32, %arg1: memref<8x16x4xf32, #tpu.memory_space<vmem>>, %arg2: memref<8x256xf32, #tpu.memory_space<vmem>>) attributes {dimension_semantics = [#tpu.dimension_semantics<parallel>], iteration_bounds = array<i64: 2>, scalar_prefetch = 0 : i64, scratch_operands = 0 : i64, tpu.core_type = #tpu.core_type<tc>, window_params = [{transform_indices = @transform_0, window_bounds = array<i64: 8, 16, 4>}, {transform_indices = @transform_1, window_bounds = array<i64: 8, 256>}]} {
    %c0 = arith.constant 0 : index
    %c0_0 = arith.constant 0 : index
    %c0_1 = arith.constant 0 : index
    %0 = vector.load %arg1[%c0, %c0_0, %c0_1] : memref<8x16x4xf32, #tpu.memory_space<vmem>>, vector<8x16x4xf32>
    "tpu.trace_start"() <{level = 10 : i32, message = "gnf,gmf->gnm"}> : () -> ()
    %cst = arith.constant dense<0.000000e+00> : vector<8x16x16xf32>
    %1 = tpu.matmul %0, %0, %cst {dimension_numbers = #tpu.dot_dimension_numbers<[2], [2], [1], [1], [0, 0, 0, 1, 1, 1], [0], [0]>} : vector<8x16x4xf32>, vector<8x16x4xf32>, vector<8x16x16xf32> -> vector<8x16x16xf32>
    "tpu.trace_stop"() : () -> ()
    %cst_2 = arith.constant 5.000000e-01 : f32
    %2 = vector.broadcast %cst_2 : f32 to vector<8x16x16xf32>
    %3 = arith.mulf %1, %2 : vector<8x16x16xf32>
    %cst_3 = arith.constant dense<0xFF800000> : vector<8x16xf32>
    %4 = vector.multi_reduction <maximumf>, %3, %cst_3 [2] : vector<8x16x16xf32> to vector<8x16xf32>
    %5 = vector.shape_cast %4 : vector<8x16xf32> to vector<8x16x1xf32>
    %6 = vector.broadcast %5 : vector<8x16x1xf32> to vector<8x16x16xf32>
    %7 = arith.subf %3, %6 : vector<8x16x16xf32>
    %8 = math.exp %7 : vector<8x16x16xf32>
    %cst_4 = arith.constant dense<0.000000e+00> : vector<8x16xf32>
    %9 = vector.multi_reduction <add>, %8, %cst_4 [2] : vector<8x16x16xf32> to vector<8x16xf32>
    %10 = vector.shape_cast %9 : vector<8x16xf32> to vector<8x16x1xf32>
    %11 = tpu.reciprocal %10 : vector<8x16x1xf32> -> vector<8x16x1xf32>
    %12 = vector.broadcast %11 : vector<8x16x1xf32> to vector<8x16x16xf32>
    %13 = arith.mulf %8, %12 : vector<8x16x16xf32>
    %14 = vector.shape_cast %13 : vector<8x16x16xf32> to vector<8x256xf32>
    %c0_5 = arith.constant 0 : index
    %c0_6 = arith.constant 0 : index
    %15 = vector.load %arg2[%c0_5, %c0_6] : memref<8x256xf32, #tpu.memory_space<vmem>>, vector<8x256xf32>
    tpu.vector_store %arg2[%c0_5, %c0_6], %14 {strides = array<i32>} : memref<8x256xf32, #tpu.memory_space<vmem>>, vector<8x256xf32>,
    return
  }
  func.func @transform_0(%arg0: i32) -> (i32, i32, i32) {
    %c0_i32 = arith.constant 0 : i32
    %c0_i32_0 = arith.constant 0 : i32
    %c0_i32_1 = arith.constant 0 : i32
    return %arg0, %c0_i32, %c0_i32_0 : i32, i32, i32
  }
  func.func @transform_1(%arg0: i32) -> (i32, i32) {
    %c0_i32 = arith.constant 0 : i32
    %c0_i32_0 = arith.constant 0 : i32
    return %arg0, %c0_i32 : i32, i32
  }
}

</mosaic_0001>

<bundles_post_ra>
// kernel: tpu_custom_call.1
= control target key start
LH: loop header
LB: loop body
LE: loop exit
PB: predicated region body
PF: predicated region fallthrough
CT: control target
= control target key end

     0   :  { %6 = vsyncpa [#allocation3], 0  ;;  %s2157_s0 = inlined_call_operand.vmem [shape: f32[16,16,4], index: 0, kind: input, shape index: {}]   ;;  %s2158_s1 = inlined_call_operand.hbm [shape: f32[16,256], index: 1, kind: output, shape index: {}]  }
   0x1   :  { %8 = vsyncpa [#allocation3 + $0x1], 0  ;;  %s1391_s6 = smov 0   ;;  %s1393_s7 = smov 0  }
   0x2   :  { %s1395_s8 = smov 0   ;;  %s1397_s9 = smov 0  }
   0x3 LB: > { %s1412_s10 = sadd.s32 4294967295, %s1370_s9   ;;  %s1149_s11 = sadd.s32 4294967294, %s1370_s9   ;;  %s1370_s9 = sphi %s1397_s9, %s2200_s9   ;;  %s1366_s8 = sphi %s1395_s8, %s2199_s8   ;;  %s1362_s7 = sphi %s1393_s7, %s2198_s7   ;;  %s1358_s6 = sphi %s1391_s6, %s2197_s6  }
   0x4   : > { %s1416_s12 = sadd.s32 1, %s1370_s9   ;;  %s47_s13 = sadd.s32 1, %s1366_s8 }
   0x5   : > { %s44_s14 = ssub.s32 %s1370_s9, %s1416_s12  ;;  %p57_p0 = scmp.ne.s32.totalorder %s1366_s8, %s1362_s7 }
   0x6   : > { %p45_p1 = scmp.eq.s32.totalorder %s44_s14, 0  ;;  %p58_p2 = scmp.eq.s32.totalorder %s1412_s10, 1 }
   0x7   : > { %p63_p3 = scmp.ne.s32.totalorder %s1362_s7, %s1358_s6  ;;  %p64_p4 = scmp.eq.s32.totalorder %s1149_s11, 1 }
   0x8   : > { %s1427_s15 = scalar_select %p45_p1, %s1366_s8, %s47_s13  }
   0x9   : > { %p1429_p5 = por %p58_p2, %p57_p0  ;;  %p1433_p6 = por %p64_p4, %p63_p3 }
   0xa   : > { %p1152_p7 = scmp.ge.s32.totalorder %s1370_s9, 1  ;;  %p92_p8 = scmp.lt.s32.totalorder %s1370_s9, 3 }
   0xc   : > { %p93_p9 = pnand %p1152_p7, %p92_p8 }
   0xd   : > { %s1154_s18 = sshll.u32 (!%p93_p9), %s1412_s10, 3  ;;  %s1374_s23 = smov (!%p93_p9), 64  }
   0xe   : > { %96 = sbr.rel (%p93_p9) target bundleno = 644 (0x284), region = 24  ;;  %p114_p10 = scmp.lt.s32.totalorder (!%p93_p9), %s1154_s18, 15 }
   0xf   : > { %s1375_s24 = smov (!%p93_p9), 80   ;;  %s1376_s25 = smov (!%p93_p9), 48  }
  0x10   : > { %s1377_s26 = smov (!%p93_p9), 32   ;;  %s1378_s27 = smov (!%p93_p9), 96  }
  0x11   : > { %s1379_s28 = smov (!%p93_p9), 16   ;;  %s1380_s29 = smov (!%p93_p9), 112  }
  0x12   : > { %s110_s30 = sand.u32 (!%p93_p9), 1, %s1362_s7   ;;  %s1195_s3 = sshll.u32 (!%p93_p9), %s1412_s10, 4 }
  0x13   : > { %s2202_s18 = smov (!%p114_p10, %s1154_s18), 15  ;;  %vm136_vm0 = vcmask 31744   ;;  %vm385_vm1 = vcmask 130048   ;;  %vm771_vm14 = vcmask 1047556   ;;  %s1153_s2 = sshll.u32 %s110_s30, 4 }
  0x14   : > { %s1194_s19 = sshll.u32 %s2202_s18, 4  ;;  %s112_s4 = scalar_lea.vmem [#allocation2], %s1153_s2 }
  0x15   : > { %s1443_s22 = scalar_lea.vmem %s2157_s0, %s1194_s19  ;;  %s1085_s13 = scalar_lea.hbm %s2158_s1, %s1195_s3 }
  0x16   : > { %v123_v0 = vld [vmem:[%s1443_s22 + $0x18] sm:$0xff]  ;;  %v125_v1 = vld [vmem:[%s1443_s22 + $0x28] sm:$0xff]  ;;  %v122_v3 = vld [vmem:[%s1443_s22 + $0x10] sm:$0xff]  ;;  %s1087_s14 = sshll.u32 %s112_s4, 4  ;;  %s1089_s18 = sshll.u32 %s1085_s13, 4  ;;  %s1088_s14 = int_to_ptr.vmem [resolvable:$true] %s1087_s14  ;;  %s1090_s18 = int_to_ptr.hbm [resolvable:$true] %s1089_s18 }
  0x17   : > { %v127_v2 = vld [vmem:[%s1443_s22 + $0x38] sm:$0xff]  ;;  %1161 = vmatpush.xpose.msk.msra.mxu1 %vm136_vm0, %v123_v0  ;;  %1165 = vmatpush.xpose.msk.msra.mxu2 %vm136_vm0, %v125_v1  ;;  %v124_v4 = vld [vmem:[%s1443_s22 + $0x20] sm:$0xff]  ;;  %v121_v5 = vld [vmem:[%s1443_s22 + $0x8] sm:$0xff]  ;;  %s1074_s10 = scalar_lea.sflag [#allocation3], %s110_s30  ;;  %s1322_s19 = sshra.s32 %s1090_s18, 4  ;;  %s1323_s19 = int_to_ptr.hbm [resolvable:$true] %s1322_s19 }
  0x18   : > { %1169 = vmatpush.xpose.msk.msra.mxu3 %vm136_vm0, %v127_v2  ;;  %v126_v6 = vld [vmem:[%s1443_s22 + $0x30] sm:$0xff]  ;;  %1157 = vmatpush.xpose.msk.msra.mxu0 %vm136_vm0, %v121_v5  ;;  %v133_v7 = vld [vmem:[%s1443_s22 + $0x68] sm:$0xff]  ;;  %v120_v8 = vld [vmem:[%s1443_s22] sm:$0xff]  ;;  %s1324_s20 = scalar_lea.hbm %s1323_s19, 16  ;;  %p1329_p0 = scmp.lt.s32.totalorder %s1323_s19, %s2158_s1 }
  0x19   : > { %v135_v9 = vld [vmem:[%s1443_s22 + $0x78] sm:$0xff]  ;;  %v129_v10 = vld [vmem:[%s1443_s22 + $0x48] sm:$0xff]  ;;  %v132_v11 = vld [vmem:[%s1443_s22 + $0x60] sm:$0xff]  ;;  %p1325_p11 = scmp.ne.s32.totalorder %s1323_s19, %s1324_s20 }
  0x1a   : > { %v134_v12 = vld [vmem:[%s1443_s22 + $0x70] sm:$0xff]  ;;  %v131_v13 = vld [vmem:[%s1443_s22 + $0x58] sm:$0xff]  ;;  %v128_v14 = vld [vmem:[%s1443_s22 + $0x40] sm:$0xff] }
  0x1b   : > { %1162 = vmatpush.xpose.msk.msra.mxu1 %vm136_vm0, %v122_v3  ;;  %1166 = vmatpush.xpose.msk.msra.mxu2 %vm136_vm0, %v124_v4  ;;  %v130_v15 = vld [vmem:[%s1443_s22 + $0x50] sm:$0xff]  ;;  %p1326_p12 = pnand %p1325_p11, %p1429_p5 }
  0x1c   : > { %1170 = vmatpush.xpose.msk.msra.mxu3 %vm136_vm0, %v126_v6  ;;  %1158 = vmatpush.xpose.msk.msra.mxu0 %vm136_vm0, %v120_v8 }
  0x1d   : > { %p1327_p13 = pneg %p1326_p12 }
  0x1e   : > { %1163 = vmatmul.msk.f32.vlgmr.msra.gmra.mxu1 %vm136_vm0, %v122_v3  ;;  %1167 = vmatmul.msk.f32.vlgmr.msra.gmra.mxu2 %vm136_vm0, %v124_v4 }
  0x1f   : > { %1181 = vmatpush.xpose.msk.msrb.mxu2 %vm136_vm0, %v133_v7  ;;  %1171 = vmatmul.msk.f32.vlgmr.msra.gmra.mxu3 %vm136_vm0, %v126_v6 }
  0x20   : > { %1185 = vmatpush.xpose.msk.msrb.mxu3 %vm136_vm0, %v135_v9  ;;  %1173 = vmatpush.xpose.msk.msrb.mxu0 %vm136_vm0, %v129_v10 }
  0x21   : > { %1159 = vmatmul.msk.f32.vlgmr.msra.gmra.mxu0 %vm136_vm0, %v120_v8  ;;  %1177 = vmatpush.xpose.msk.msrb.mxu1 %vm136_vm0, %v131_v13 }
  0x23   : > { %1182 = vmatpush.xpose.msk.msrb.mxu2 %vm136_vm0, %v132_v11 }
  0x24   : > { %1186 = vmatpush.xpose.msk.msrb.mxu3 %vm136_vm0, %v134_v12  ;;  %1174 = vmatpush.xpose.msk.msrb.mxu0 %vm136_vm0, %v128_v14 }
  0x25   : > { %1178 = vmatpush.xpose.msk.msrb.mxu1 %vm136_vm0, %v130_v15 }
  0x26   : > { %1164 = vmatmul.msk.f32.gmra.mxu1 %vm136_vm0, %v123_v0  ;;  %1168 = vmatmul.msk.f32.gmra.mxu2 %vm136_vm0, %v125_v1 }
  0x27   : > { %1172 = vmatmul.msk.f32.gmra.mxu3 %vm136_vm0, %v127_v2 }
  0x29   : > { %1160 = vmatmul.msk.f32.gmra.mxu0 %vm136_vm0, %v121_v5 }
  0x2e   : > { %1183 = vmatmul.msk.f32.vlgmr.msrb.gmra.mxu2 %vm136_vm0, %v132_v11  ;;  %1179 = vmatmul.msk.f32.vlgmr.msrb.gmra.mxu1 %vm136_vm0, %v130_v15 }
  0x2f   : > { %1187 = vmatmul.msk.f32.vlgmr.msrb.gmra.mxu3 %vm136_vm0, %v134_v12 }
  0x31   : > { %1175 = vmatmul.msk.f32.vlgmr.msrb.gmra.mxu0 %vm136_vm0, %v128_v14 }
  0x36   : > { %1184 = vmatmul.msk.f32.gmra.mxu2 %vm136_vm0, %v133_v7  ;;  %1180 = vmatmul.msk.f32.gmra.mxu1 %vm136_vm0, %v131_v13 }
  0x37   : > { %1188 = vmatmul.msk.f32.gmra.mxu3 %vm136_vm0, %v135_v9 }
  0x39   : > { %1176 = vmatmul.msk.f32.gmra.mxu0 %vm136_vm0, %v129_v10 }
  0x9b   : > { %v189_v16 = vpop.f32.mrf.mxu1 }
  0x9c   : > { %v1493_v17 = vmul.f32 0.5, %v189_v16 }
  0x9e   : > { %v160_v18 = vpop.f32.mrf.mxu0  ;;  %v392_v19 = vsel %vm385_vm1, %v1493_v17, -inf }
  0x9f   : > { %393 = vmax.xlane.f32.xlu2 %v392_v19  ;;  %v1541_v55 = vmul.f32 0.5, %v160_v18 }
  0xa1   : > { %v218_v20 = vpop.f32.mrf.mxu2  ;;  %v386_v59 = vsel %vm385_vm1, %v1541_v55, -inf }
  0xa2   : > { %v247_v21 = vpop.f32.mrf.mxu3  ;;  %v1505_v28 = vmul.f32 0.5, %v218_v20 }
  0xa3   : > { %v1497_v22 = vmul.f32 0.5, %v247_v21  ;;  %v192_v23 = vpop.f32.mrf.mxu1 }
  0xa4   : > { %v1499_v24 = vmul.f32 0.5, %v192_v23  ;;  %v398_v33 = vsel %vm385_vm1, %v1505_v28, -inf }
  0xa5   : > { %v404_v25 = vsel %vm385_vm1, %v1497_v22, -inf }
  0xa6   : > { %v163_v26 = vpop.f32.mrf.mxu0  ;;  %405 = vmax.xlane.f32.xlu0 %v404_v25  ;;  %v395_v27 = vsel %vm385_vm1, %v1499_v24, -inf }
  0xa7   : > { %396 = vmax.xlane.f32.xlu2 %v395_v27  ;;  %v1551_v61 = vmul.f32 0.5, %v163_v26 }
  0xa9   : > { %v221_v29 = vpop.f32.mrf.mxu2  ;;  %v389_v63 = vsel %vm385_vm1, %v1551_v61, -inf }
  0xaa   : > { %v1507_v30 = vmul.f32 0.5, %v221_v29  ;;  %v250_v31 = vpop.f32.mrf.mxu3 }
  0xab   : > { %v1515_v36 = vmul.f32 0.5, %v250_v31  ;;  %v305_v42 = vpop.f32.mrf.mxu1 }
  0xac   : > { %v401_v32 = vsel %vm385_vm1, %v1507_v30, -inf  ;;  %v1529_v47 = vmul.f32 0.5, %v305_v42 }
  0xad   : > { %402 = vmax.xlane.f32.xlu1 %v401_v32  ;;  %v407_v41 = vsel %vm385_vm1, %v1515_v36, -inf }
  0xae   : > { %v276_v34 = vpop.f32.mrf.mxu0  ;;  %399 = vmax.xlane.f32.xlu0 %v398_v33  ;;  %v416_v49 = vsel %vm385_vm1, %v1529_v47, -inf }
  0xaf   : > { %v1513_v35 = vmul.f32 0.5, %v276_v34 }
  0xb1   : > { %v334_v37 = vpop.f32.mrf.mxu2  ;;  %v410_v39 = vsel %vm385_vm1, %v1513_v35, -inf }
  0xb2   : > { %v363_v38 = vpop.f32.mrf.mxu3  ;;  %v1525_v45 = vmul.f32 0.5, %v334_v37 }
  0xb3   : > { %v1519_v40 = vmul.f32 0.5, %v363_v38  ;;  %v308_v58 = vpop.f32.mrf.mxu1 }
  0xb4   : > { %v422_v48 = vsel %vm385_vm1, %v1525_v45, -inf  ;;  %v1549_v60 = vmul.f32 0.5, %v308_v58 }
  0xb5   : > { %v428_v43 = vsel %vm385_vm1, %v1519_v40, -inf  ;;  %411 = vmax.xlane.f32.xlu1 %v410_v39 }
  0xb6   : > { %v279_v44 = vpop.f32.mrf.mxu0  ;;  %408 = vmax.xlane.f32.xlu0 %v407_v41  ;;  %429 = vmax.xlane.f32.xlu2 %v428_v43  ;;  %v419_v62 = vsel %vm385_vm1, %v1549_v60, -inf }
  0xb7   : > { %v1527_v46 = vmul.f32 0.5, %v279_v44 }
  0xb9   : > { %v413_v50 = vsel %vm385_vm1, %v1527_v46, -inf  ;;  %v337_v51 = vpop.f32.mrf.mxu2 }
  0xba   : > { %v366_v52 = vpop.f32.mrf.mxu3  ;;  %v1537_v53 = vmul.f32 0.5, %v337_v51 }
  0xbb   : > { %v1539_v54 = vmul.f32 0.5, %v366_v52 }
  0xbc   : > { %v425_v56 = vsel %vm385_vm1, %v1537_v53, -inf }
  0xbd   : > { %423 = vmax.xlane.f32.xlu1 %v422_v48  ;;  %v431_v57 = vsel %vm385_vm1, %v1539_v54, -inf }
  0xbe   : > { %417 = vmax.xlane.f32.xlu0 %v416_v49  ;;  %414 = vmax.xlane.f32.xlu2 %v413_v50 }
  0xc5   : > { %426 = vmax.xlane.f32.xlu1 %v425_v56 }
  0xc6   : > { %432 = vmax.xlane.f32.xlu0 %v431_v57  ;;  %387 = vmax.xlane.f32.xlu2 %v386_v59 }
  0xcd   : > { %420 = vmax.xlane.f32.xlu1 %v419_v62 }
  0xce   : > { %390 = vmax.xlane.f32.xlu0 %v389_v63 }
 0x112   : > { %v394_v0 = vpop.xlane.xlu2 %393 }
 0x113   : > { %v436_v1 = vsub.f32 %v1493_v17, %v394_v0 }
 0x115   : > { %v454_v2 = vmul.f32 1.442695, %v436_v1 }
 0x117   : > { %1244 = vpow2.f32 %v454_v2 }
 0x119   : > { %v406_v3 = vpop.xlane.xlu0 %405 }
 0x11a   : > { %v440_v4 = vsub.f32 %v1497_v22, %v406_v3  ;;  %v397_v5 = vpop.xlane.xlu2 %396 }
 0x11b   : > { %v437_v6 = vsub.f32 %v1499_v24, %v397_v5 }
 0x11c   : > { %v462_v7 = vmul.f32 1.442695, %v440_v4 }
 0x11d   : > { %v1560_v8 = vpop.eup %1244  ;;  %v456_v9 = vmul.f32 1.442695, %v437_v6 }
 0x11e   : > { %1246 = vpow2.f32 %v462_v7  ;;  %v488_v10 = vsel %vm385_vm1, %v1560_v8, 0.0 }
 0x11f   : > { %1248 = vpow2.f32 %v456_v9  ;;  %489 = vadd.xlane.f32.xlu2 %v488_v10 }
 0x120   : > { %v403_v11 = vpop.xlane.xlu1 %402 }
 0x121   : > { %v400_v12 = vpop.xlane.xlu0 %399  ;;  %v439_v23 = vsub.f32 %v1507_v30, %v403_v11 }
 0x122   : > { %v438_v13 = vsub.f32 %v1505_v28, %v400_v12 }
 0x123   : > { %v460_v27 = vmul.f32 1.442695, %v439_v23 }
 0x124   : > { %v1565_v14 = vpop.eup %1246  ;;  %v458_v15 = vmul.f32 1.442695, %v438_v13 }
 0x125   : > { %v1567_v16 = vpop.eup %1248  ;;  %v500_v17 = vsel %vm385_vm1, %v1565_v14, 0.0 }
 0x126   : > { %1250 = vpow2.f32 %v458_v15  ;;  %501 = vadd.xlane.f32.xlu1 %v500_v17  ;;  %v491_v18 = vsel %vm385_vm1, %v1567_v16, 0.0 }
 0x127   : > { %492 = vadd.xlane.f32.xlu0 %v491_v18 }
 0x128   : > { %v412_v19 = vpop.xlane.xlu1 %411 }
 0x129   : > { %v409_v20 = vpop.xlane.xlu0 %408  ;;  %v430_v25 = vpop.xlane.xlu2 %429  ;;  %v442_v30 = vsub.f32 %v1513_v35, %v412_v19 }
 0x12a   : > { %v441_v21 = vsub.f32 %v1515_v36, %v409_v20  ;;  %v448_v33 = vsub.f32 %v1519_v40, %v430_v25 }
 0x12b   : > { %v466_v42 = vmul.f32 1.442695, %v442_v30 }
 0x12c   : > { %v1574_v22 = vpop.eup %1250  ;;  %v464_v24 = vmul.f32 1.442695, %v441_v21  ;;  %v478_v41 = vmul.f32 1.442695, %v448_v33 }
 0x12d   : > { %v494_v26 = vsel %vm385_vm1, %v1574_v22, 0.0 }
 0x12e   : > { %1252 = vpow2.f32 %v464_v24  ;;  %495 = vadd.xlane.f32.xlu1 %v494_v26 }
 0x12f   : > { %1254 = vpow2.f32 %v460_v27 }
 0x130   : > { %v424_v28 = vpop.xlane.xlu1 %423 }
 0x131   : > { %v418_v29 = vpop.xlane.xlu0 %417  ;;  %v446_v31 = vsub.f32 %v1525_v45, %v424_v28  ;;  %v415_v39 = vpop.xlane.xlu2 %414 }
 0x132   : > { %v444_v32 = vsub.f32 %v1529_v47, %v418_v29  ;;  %v443_v35 = vsub.f32 %v1527_v46, %v415_v39 }
 0x133   : > { %v474_v34 = vmul.f32 1.442695, %v446_v31 }
 0x134   : > { %v1582_v36 = vpop.eup %1252  ;;  %v470_v37 = vmul.f32 1.442695, %v444_v32  ;;  %v468_v46 = vmul.f32 1.442695, %v443_v35 }
 0x135   : > { %1256 = vpow2.f32 %v474_v34  ;;  %v503_v38 = vsel %vm385_vm1, %v1582_v36, 0.0  ;;  %v1588_v45 = vpop.eup %1254 }
 0x136   : > { %1258 = vpow2.f32 %v470_v37  ;;  %504 = vadd.xlane.f32.xlu2 %v503_v38 }
 0x137   : > { %1260 = vpow2.f32 %v478_v41 }
 0x138   : > { %v427_v43 = vpop.xlane.xlu1 %426  ;;  %1262 = vpow2.f32 %v466_v42 }
 0x139   : > { %v433_v44 = vpop.xlane.xlu0 %432  ;;  %v447_v40 = vsub.f32 %v1537_v53, %v427_v43  ;;  %v497_v53 = vsel %vm385_vm1, %v1588_v45, 0.0  ;;  %v388_v57 = vpop.xlane.xlu2 %387 }
 0x13a   : > { %v449_v50 = vsub.f32 %v1539_v54, %v433_v44  ;;  %v434_v1 = vsub.f32 %v1541_v55, %v388_v57 }
 0x13b   : > { %v1590_v47 = vpop.eup %1256  ;;  %v476_v48 = vmul.f32 1.442695, %v447_v40 }
 0x13c   : > { %v1593_v49 = vpop.eup %1258  ;;  %v518_v51 = vsel %vm385_vm1, %v1590_v47, 0.0  ;;  %v480_v56 = vmul.f32 1.442695, %v449_v50  ;;  %v450_v6 = vmul.f32 1.442695, %v434_v1 }
 0x13d   : > { %1264 = vpow2.f32 %v476_v48  ;;  %v512_v52 = vsel %vm385_vm1, %v1593_v49, 0.0  ;;  %519 = vadd.xlane.f32.xlu0 %v518_v51  ;;  %v1602_v59 = vpop.eup %1260 }
 0x13e   : > { %513 = vadd.xlane.f32.xlu1 %v512_v52  ;;  %498 = vadd.xlane.f32.xlu2 %v497_v53  ;;  %v1605_v63 = vpop.eup %1262  ;;  %1266 = vpow2.f32 %v468_v46  ;;  %v524_v4 = vsel %vm385_vm1, %v1602_v59, 0.0 }
 0x13f   : > { %1268 = vpow2.f32 %v480_v56 }
 0x140   : > { %v421_v58 = vpop.xlane.xlu1 %420 }
 0x141   : > { %v391_v54 = vpop.xlane.xlu0 %390  ;;  %v445_v62 = vsub.f32 %v1549_v60, %v421_v58  ;;  %v506_v60 = vsel %vm385_vm1, %v1605_v63, 0.0 }
 0x142   : > { %v435_v3 = vsub.f32 %v1551_v61, %v391_v54 }
 0x143   : > { %v1607_v0 = vpop.eup %1264  ;;  %v472_v2 = vmul.f32 1.442695, %v445_v62 }
 0x144   : > { %v521_v5 = vsel %vm385_vm1, %v1607_v0, 0.0  ;;  %v452_v7 = vmul.f32 1.442695, %v435_v3  ;;  %v1617_v55 = vpop.eup %1266 }
 0x145   : > { %1270 = vpow2.f32 %v472_v2  ;;  %525 = vadd.xlane.f32.xlu0 %v524_v4  ;;  %v1619_v9 = vpop.eup %1268  ;;  %v509_v11 = vsel %vm385_vm1, %v1617_v55, 0.0  ;;  %v1372_v2 = vmov 1983009808  }
 0x146   : > { %522 = vadd.xlane.f32.xlu1 %v521_v5  ;;  %507 = vadd.xlane.f32.xlu2 %v506_v60  ;;  %1272 = vpow2.f32 %v450_v6  ;;  %v527_v12 = vsel %vm385_vm1, %v1619_v9, 0.0  ;;  %v776_v3 = vunpack.c.l.s4 %v1372_v2 }
 0x147   : > { %1274 = vpow2.f32 %v452_v7 }
 0x14b   : > { %v1621_v61 = vpop.eup %1270 }
 0x14c   : > { %v515_v10 = vsel %vm385_vm1, %v1621_v61, 0.0  ;;  %v1629_v13 = vpop.eup %1272 }
 0x14d   : > { %510 = vadd.xlane.f32.xlu0 %v509_v11  ;;  %v1631_v15 = vpop.eup %1274  ;;  %v482_v17 = vsel %vm385_vm1, %v1629_v13, 0.0 }
 0x14e   : > { %528 = vadd.xlane.f32.xlu1 %v527_v12  ;;  %516 = vadd.xlane.f32.xlu2 %v515_v10  ;;  %v485_v18 = vsel %vm385_vm1, %v1631_v15, 0.0 }
 0x155   : > { %483 = vadd.xlane.f32.xlu0 %v482_v17  ;;  %v1650_v17 = vunpack.c.0.s8 %v776_v3 }
 0x156   : > { %486 = vadd.xlane.f32.xlu1 %v485_v18 }
 0x192   : > { %v490_v19 = vpop.xlane.xlu2 %489 }
 0x193   : > { %1276 = vrcp.f32 %v490_v19  ;;  %v569_v34 = vand.u32 2147483648, %v490_v19  ;;  %vm563_vm3 = vweird.f32 %v490_v19  ;;  %v567_v37 = vand.u32 2147483647, %v490_v19 }
 0x195   : > { %v570_v40 = vor.u32 1.1754944e-38, %v569_v34  ;;  %vm568_vm7 = vcmp.eq.f32.partialorder %v567_v37, 8.507059e+37 }
 0x199   : > { %v1277_v20 = vpop.eup %1276  ;;  %v502_v21 = vpop.xlane.xlu1 %501 }
 0x19a   : > { %v559_v23 = vmul.f32 %v1277_v20, %v490_v19  ;;  %1278 = vrcp.f32 %v502_v21  ;;  %v493_v24 = vpop.xlane.xlu0 %492  ;;  %vm564_vm2 = vweird.f32 %v1277_v20  ;;  %v625_v38 = vand.u32 2147483648, %v502_v21 }
 0x19b   : > { %1280 = vrcp.f32 %v493_v24  ;;  %vm565_vm4 = vmor %vm563_vm3, %vm564_vm2  ;;  %v623_v43 = vand.u32 2147483647, %v502_v21  ;;  %vm619_vm6 = vweird.f32 %v502_v21  ;;  %v583_v57 = vand.u32 2147483648, %v493_v24 }
 0x19c   : > { %v560_v25 = vsub.f32 1.0, %v559_v23  ;;  %v626_v50 = vor.u32 1.1754944e-38, %v625_v38  ;;  %vm577_vm11 = vweird.f32 %v493_v24  ;;  %v581_v54 = vand.u32 2147483647, %v493_v24 }
 0x19d   : > { %vm624_vm10 = vcmp.eq.f32.partialorder %v623_v43, 8.507059e+37  ;;  %v584_v6 = vor.u32 1.1754944e-38, %v583_v57 }
 0x19e   : > { %v561_v26 = vmul.f32 %v1277_v20, %v560_v25  ;;  %vm582_vm13 = vcmp.eq.f32.partialorder %v581_v54, 8.507059e+37 }
 0x1a0   : > { %v1279_v27 = vpop.eup %1278  ;;  %v562_v32 = vadd.f32 %v1277_v20, %v561_v26 }
 0x1a1   : > { %v1281_v28 = vpop.eup %1280  ;;  %v615_v29 = vmul.f32 %v1279_v27, %v502_v21  ;;  %v1637_v31 = vpop.xlane.xlu1 %495  ;;  %vm620_vm5 = vweird.f32 %v1279_v27 }
 0x1a2   : > { %v573_v33 = vmul.f32 %v1281_v28, %v493_v24  ;;  %1282 = vrcp.f32 %v1637_v31  ;;  %v566_v42 = vsel %vm565_vm4, %v1277_v20, %v562_v32  ;;  %vm621_vm8 = vmor %vm619_vm6, %vm620_vm5  ;;  %vm578_vm9 = vweird.f32 %v1281_v28 }
 0x1a3   : > { %v616_v30 = vsub.f32 1.0, %v615_v29  ;;  %v571_v51 = vsel %vm568_vm7, %v570_v40, %v566_v42  ;;  %vm579_vm12 = vmor %vm577_vm11, %vm578_vm9  ;;  %vm591_vm0 = vweird.f32 %v1637_v31  ;;  %v595_v24 = vand.u32 2147483647, %v1637_v31 }
 0x1a4   : > { %v574_v39 = vsub.f32 1.0, %v573_v33  ;;  %v756_v1 = vmul.f32 %v1560_v8, %v571_v51 }
 0x1a5   : > { %v617_v41 = vmul.f32 %v1279_v27, %v616_v30  ;;  %vm596_vm3 = vcmp.eq.f32.partialorder %v595_v24, 8.507059e+37 }
 0x1a6   : > { %v575_v44 = vmul.f32 %v1281_v28, %v574_v39  ;;  %v785_v10 = vrot.slane %v756_v1, 4 }
 0x1a7   : > { %v618_v35 = vadd.f32 %v1279_v27, %v617_v41 }
 0x1a8   : > { %v1283_v48 = vpop.eup %1282  ;;  %v576_v53 = vadd.f32 %v1281_v28, %v575_v44 }
 0x1a9   : > { %v622_v52 = vsel %vm621_vm8, %v1279_v27, %v618_v35  ;;  %v587_v46 = vmul.f32 %v1283_v48, %v1637_v31  ;;  %v1641_v56 = vpop.xlane.xlu2 %504  ;;  %vm592_vm15 = vweird.f32 %v1283_v48 }
 0x1aa   : > { %1284 = vrcp.f32 %v1641_v56  ;;  %v627_v58 = vsel %vm624_vm10, %v626_v50, %v622_v52  ;;  %v580_v4 = vsel %vm579_vm12, %v1281_v28, %v576_v53  ;;  %vm593_vm2 = vmor %vm591_vm0, %vm592_vm15  ;;  %v637_v27 = vand.u32 2147483647, %v1641_v56 }
 0x1ab   : > { %v588_v62 = vsub.f32 1.0, %v587_v46  ;;  %v760_v60 = vmul.f32 %v1565_v14, %v627_v58  ;;  %v585_v11 = vsel %vm582_vm13, %v584_v6, %v580_v4  ;;  %v597_v14 = vand.u32 2147483648, %v1637_v31 }
 0x1ac   : > { %v1663_v23 = vmul.f32 %v1567_v16, %v585_v11  ;;  %v639_v28 = vand.u32 2147483648, %v1641_v56  ;;  %vm633_vm4 = vweird.f32 %v1641_v56  ;;  %vm1678_vm5 = vcmp.eq.f32.partialorder %v637_v27, 8.507059e+37 }
 0x1ad   : > { %v589_v5 = vmul.f32 %v1283_v48, %v588_v62  ;;  %v786_v21 = vsel %vm771_vm14, %v760_v60, %v785_v10  ;;  %v783_v26 = vrot.slane %v760_v60, 4  ;;  %v598_v33 = vor.u32 1.1754944e-38, %v597_v14 }
 0x1ae   : > { %v1671_v32 = vperm.slane %v786_v21, %v1650_v17  ;;  %v897_v31 = vrot.slane %v1663_v23, 4  ;;  %v640_v38 = vor.u32 1.1754944e-38, %v639_v28 }
 0x1af   : > { %v590_v18 = vadd.f32 %v1283_v48, %v589_v5  ;;  %v784_v42 = vsel %vm771_vm14, %v783_v26, %v756_v1 }
 0x1b0   : > { %v1646_v7 = vpop.eup %1284  ;;  %v1648_v12 = vpop.xlane.xlu0 %519  ;;  %v1707_v57 = vperm.slane %v784_v42, %v1650_v17 }
 0x1b1   : > { %v629_v8 = vmul.f32 %v1646_v7, %v1641_v56  ;;  %1286 = vrcp.f32 %v1648_v12  ;;  %v1655_v19 = vpop.xlane.xlu1 %513  ;;  %v1659_v20 = vpop.xlane.xlu2 %498  ;;  %v594_v29 = vsel %vm593_vm2, %v1283_v48, %v590_v18  ;;  %v707_v44 = vand.u32 2147483647, %v1648_v12 }
 0x1b2   : > { %1288 = vrcp.f32 %v1655_v19  ;;  %v599_v30 = vsel %vm596_vm3, %v598_v33, %v594_v29  ;;  %v709_v40 = vand.u32 2147483648, %v1648_v12  ;;  %v831_v48 = vrot.slane %v1671_v32, 4 }
 0x1b3   : > { %v630_v25 = vsub.f32 1.0, %v629_v8  ;;  %1290 = vrcp.f32 %v1659_v20  ;;  %vm634_vm6 = vweird.f32 %v1646_v7  ;;  %v1702_v46 = vmul.f32 %v1574_v22, %v599_v30 }
 0x1b4   : > { %vm703_vm7 = vweird.f32 %v1648_v12  ;;  %vm675_vm8 = vweird.f32 %v1655_v19  ;;  %vm1717_vm9 = vmor %vm633_vm4, %vm634_vm6  ;;  %vm1721_vm10 = vcmp.eq.f32.partialorder %v707_v44, 8.507059e+37  ;;  %v710_v3 = vor.u32 1.1754944e-38, %v709_v40 }
 0x1b5   : > { %v631_v16 = vmul.f32 %v1646_v7, %v630_v25  ;;  %v679_v4 = vand.u32 2147483647, %v1655_v19  ;;  %v681_v5 = vand.u32 2147483648, %v1655_v19  ;;  %v609_v10 = vand.u32 2147483647, %v1659_v20 }
 0x1b6   : > { %v611_v8 = vand.u32 2147483648, %v1659_v20  ;;  %v770_v14 = vrot.slane %v1702_v46, 4  ;;  %vm605_vm15 = vweird.f32 %v1659_v20 }
 0x1b7   : > { %v1674_v34 = vpop.eup %1286  ;;  %v632_v50 = vadd.f32 %v1646_v7, %v631_v16  ;;  %vm1747_vm13 = vcmp.eq.f32.partialorder %v679_v4, 8.507059e+37  ;;  %v682_v29 = vor.u32 1.1754944e-38, %v681_v5  ;;  %vm1772_vm3 = vcmp.eq.f32.partialorder %v609_v10, 8.507059e+37 }
 0x1b8   : > { %v699_v39 = vmul.f32 %v1674_v34, %v1648_v12  ;;  %v1684_v41 = vpop.xlane.xlu0 %525  ;;  %v1687_v43 = vpop.eup %1288  ;;  %vm704_vm11 = vweird.f32 %v1674_v34  ;;  %v612_v42 = vor.u32 1.1754944e-38, %v611_v8 }
 0x1b9   : > { %1292 = vrcp.f32 %v1684_v41  ;;  %v1692_v35 = vpop.xlane.xlu1 %522  ;;  %v671_v52 = vmul.f32 %v1687_v43, %v1655_v19  ;;  %v1699_v53 = vpop.eup %1290  ;;  %v636_v60 = vsel %vm1717_vm9, %v1646_v7, %v632_v50  ;;  %vm676_vm12 = vweird.f32 %v1687_v43  ;;  %vm1755_vm0 = vmor %vm703_vm7, %vm704_vm11 }
 0x1ba   : > { %v700_v51 = vsub.f32 1.0, %v699_v39  ;;  %1294 = vrcp.f32 %v1692_v35  ;;  %v601_v62 = vmul.f32 %v1699_v53, %v1659_v20  ;;  %v1713_v1 = vpop.xlane.xlu2 %507  ;;  %v641_v25 = vsel %vm1678_vm5, %v640_v38, %v636_v60  ;;  %vm1768_vm2 = vmor %vm675_vm8, %vm676_vm12 }
 0x1bb   : > { %v672_v54 = vsub.f32 1.0, %v671_v52  ;;  %1296 = vrcp.f32 %v1713_v1  ;;  %v735_v16 = vand.u32 2147483647, %v1684_v41  ;;  %v737_v30 = vand.u32 2147483648, %v1684_v41 }
 0x1bc   : > { %v701_v58 = vmul.f32 %v1674_v34, %v700_v51  ;;  %v602_v56 = vsub.f32 1.0, %v601_v62  ;;  %vm731_vm4 = vweird.f32 %v1684_v41  ;;  %v1780_v40 = vmul.f32 %v1582_v36, %v641_v25 }
 0x1bd   : > { %v673_v6 = vmul.f32 %v1687_v43, %v672_v54  ;;  %vm606_vm5 = vweird.f32 %v1699_v53  ;;  %vm1792_vm6 = vcmp.eq.f32.partialorder %v735_v16, 8.507059e+37  ;;  %vm717_vm9 = vweird.f32 %v1692_v35 }
 0x1be   : > { %v702_v18 = vadd.f32 %v1674_v34, %v701_v58  ;;  %v603_v27 = vmul.f32 %v1699_v53, %v602_v56  ;;  %v721_v58 = vand.u32 2147483647, %v1692_v35  ;;  %vm1808_vm8 = vmor %vm605_vm15, %vm606_vm5  ;;  %v651_v56 = vand.u32 2147483647, %v1713_v1 }
 0x1bf   : > { %v1732_v11 = vpop.eup %1292  ;;  %v674_v21 = vadd.f32 %v1687_v43, %v673_v6  ;;  %vm647_vm12 = vweird.f32 %v1713_v1 }
 0x1c0   : > { %v727_v7 = vmul.f32 %v1732_v11, %v1684_v41  ;;  %v1743_v24 = vpop.eup %1294  ;;  %v706_v38 = vsel %vm1755_vm0, %v1674_v34, %v702_v18  ;;  %v604_v51 = vadd.f32 %v1699_v53, %v603_v27  ;;  %v1797_v22 = vpop.xlane.xlu0 %510  ;;  %vm732_vm7 = vweird.f32 %v1732_v11 }
 0x1c1   : > { %v1761_v37 = vpop.xlane.xlu1 %528  ;;  %v713_v44 = vmul.f32 %v1743_v24, %v1692_v35  ;;  %v678_v19 = vsel %vm1768_vm2, %v1687_v43, %v674_v21  ;;  %v1297_v50 = vpop.eup %1296  ;;  %v711_v36 = vsel %vm1721_vm10, %v710_v3, %v706_v38  ;;  %v738_v43 = vor.u32 1.1754944e-38, %v737_v30  ;;  %vm1834_vm11 = vmor %vm731_vm4, %vm732_vm7 }
 0x1c2   : > { %v728_v33 = vsub.f32 1.0, %v727_v7  ;;  %1298 = vrcp.f32 %v1761_v37  ;;  %v643_v62 = vmul.f32 %v1297_v50, %v1713_v1  ;;  %v683_v4 = vsel %vm1747_vm13, %v682_v29, %v678_v19  ;;  %v1815_v10 = vpop.xlane.xlu2 %516 }
 0x1c3   : > { %v714_v52 = vsub.f32 1.0, %v713_v44  ;;  %v723_v3 = vand.u32 2147483648, %v1692_v35  ;;  %v1818_v18 = vmul.f32 %v1590_v47, %v711_v36  ;;  %v608_v20 = vsel %vm1808_vm8, %v1699_v53, %v604_v51 }
 0x1c4   : > { %v729_v34 = vmul.f32 %v1732_v11, %v728_v33  ;;  %v644_v6 = vsub.f32 1.0, %v643_v62  ;;  %vm1823_vm10 = vcmp.eq.f32.partialorder %v721_v58, 8.507059e+37  ;;  %v653_v21 = vand.u32 2147483648, %v1713_v1 }
 0x1c5   : > { %v715_v60 = vmul.f32 %v1743_v24, %v714_v52  ;;  %1300 = vrcp.f32 %v1797_v22  ;;  %v1830_v7 = vmul.f32 %v1593_v49, %v683_v4  ;;  %vm648_vm13 = vweird.f32 %v1297_v50 }
 0x1c6   : > { %v730_v5 = vadd.f32 %v1732_v11, %v729_v34  ;;  %v645_v25 = vmul.f32 %v1297_v50, %v644_v6  ;;  %vm718_vm15 = vweird.f32 %v1743_v24  ;;  %1302 = vrcp.f32 %v1815_v10  ;;  %vm649_vm0 = vmor %vm647_vm12, %vm648_vm13 }
 0x1c7   : > { %v716_v27 = vadd.f32 %v1743_v24, %v715_v60  ;;  %v613_v49 = vsel %vm1772_vm3, %v612_v42, %v608_v20  ;;  %v724_v41 = vor.u32 1.1754944e-38, %v723_v3  ;;  %v795_v33 = vrot.slane %v1818_v18, 4  ;;  %vm1860_vm3 = vmor %vm717_vm9, %vm718_vm15 }
 0x1c8   : > { %v1839_v53 = vpop.eup %1298  ;;  %v734_v26 = vsel %vm1834_vm11, %v1732_v11, %v730_v5  ;;  %v646_v28 = vadd.f32 %v1297_v50, %v645_v25  ;;  %vm652_vm2 = vcmp.eq.f32.partialorder %v651_v56, 8.507059e+37  ;;  %v654_v11 = vor.u32 1.1754944e-38, %v653_v21  ;;  %v1878_v58 = vpop.xlane.xlu0 %483 }
 0x1c9   : > { %v741_v1 = vmul.f32 %v1839_v53, %v1761_v37  ;;  %v1851_v29 = vpop.xlane.xlu1 %486  ;;  %v751_v16 = vand.u32 2147483648, %v1761_v37  ;;  %v809_v30 = vrot.slane %v1830_v7, 4  ;;  %v739_v38 = vsel %vm1792_vm6, %v738_v43, %v734_v26 }
 0x1ca   : > { %v650_v39 = vsel %vm649_vm0, %v1297_v50, %v646_v28  ;;  %v1867_v19 = vmul.f32 %v1588_v45, %v613_v49  ;;  %v720_v34 = vsel %vm1860_vm3, %v1743_v24, %v716_v27  ;;  %1304 = vrcp.f32 %v1851_v29 }
 0x1cb   : > { %v742_v42 = vsub.f32 1.0, %v741_v1  ;;  %v1864_v44 = vpop.eup %1300  ;;  %v655_v51 = vsel %vm652_vm2, %v654_v11, %v650_v39  ;;  %vm745_vm4 = vweird.f32 %v1761_v37  ;;  %v749_v52 = vand.u32 2147483647, %v1761_v37 }
 0x1cc   : > { %v657_v50 = vmul.f32 %v1864_v44, %v1797_v22  ;;  %v1880_v45 = vpop.eup %1302  ;;  %v1883_v36 = vmul.f32 %v1602_v59, %v739_v38  ;;  %v762_v24 = vmul.f32 %v1605_v63, %v655_v51  ;;  %v1886_v54 = vor.u32 1.1754944e-38, %v751_v16 }
 0x1cd   : > { %v743_v35 = vmul.f32 %v1839_v53, %v742_v42  ;;  %vm661_vm5 = vweird.f32 %v1797_v22  ;;  %v725_v43 = vsel %vm1823_vm10, %v724_v41, %v720_v34  ;;  %v665_v4 = vand.u32 2147483647, %v1797_v22 }
 0x1ce   : > { %v658_v62 = vsub.f32 1.0, %v657_v50  ;;  %v685_v5 = vmul.f32 %v1880_v45, %v1815_v10  ;;  %vm746_vm6 = vweird.f32 %v1839_v53  ;;  %v667_v59 = vand.u32 2147483648, %v1797_v22 }
 0x1cf   : > { %v695_v60 = vand.u32 2147483648, %v1815_v10  ;;  %1306 = vrcp.f32 %v1878_v58  ;;  %v744_v63 = vadd.f32 %v1839_v53, %v743_v35  ;;  %v553_v6 = vand.u32 2147483647, %v1851_v29  ;;  %vm1914_vm8 = vmor %vm745_vm4, %vm746_vm6 }
 0x1d0   : > { %v659_v2 = vmul.f32 %v1864_v44, %v658_v62  ;;  %v686_v3 = vsub.f32 1.0, %v685_v5  ;;  %v1305_v56 = vpop.eup %1304  ;;  %v807_v20 = vrot.slane %v1883_v36, 4  ;;  %v1903_v8 = vmul.f32 %v1607_v0, %v725_v43 }
 0x1d1   : > { %v797_v21 = vrot.slane %v762_v24, 4  ;;  %vm689_vm7 = vweird.f32 %v1815_v10  ;;  %v693_v25 = vand.u32 2147483647, %v1815_v10  ;;  %v545_v26 = vmul.f32 %v1305_v56, %v1851_v29 }
 0x1d2   : > { %v687_v47 = vmul.f32 %v1880_v45, %v686_v3  ;;  %v555_v27 = vand.u32 2147483648, %v1851_v29  ;;  %vm1918_vm9 = vcmp.eq.f32.partialorder %v749_v52, 8.507059e+37  ;;  %v660_v41 = vadd.f32 %v1864_v44, %v659_v2 }
 0x1d3   : > { %vm662_vm10 = vweird.f32 %v1864_v44  ;;  %v696_v28 = vor.u32 1.1754944e-38, %v695_v60  ;;  %vm549_vm11 = vweird.f32 %v1851_v29  ;;  %v748_v1 = vsel %vm1914_vm8, %v1839_v53, %v744_v63 }
 0x1d4   : > { %vm1928_vm12 = vcmp.eq.f32.partialorder %v665_v4, 8.507059e+37  ;;  %vm690_vm13 = vweird.f32 %v1880_v45  ;;  %v546_v11 = vsub.f32 1.0, %v545_v26  ;;  %vm1933_vm15 = vcmp.eq.f32.partialorder %v553_v6, 8.507059e+37  ;;  %vm1944_vm0 = vmor %vm661_vm5, %vm662_vm10 }
 0x1d5   : > { %v1307_v38 = vpop.eup %1306  ;;  %v688_v12 = vadd.f32 %v1880_v45, %v687_v47  ;;  %v798_v39 = vsel %vm771_vm14, %v1818_v18, %v797_v21  ;;  %v810_v53 = vsel %vm771_vm14, %v1883_v36, %v809_v30  ;;  %vm550_vm2 = vweird.f32 %v1305_v56  ;;  %vm1959_vm3 = vmor %vm689_vm7, %vm690_vm13 }
 0x1d6   : > { %v547_v34 = vmul.f32 %v1305_v56, %v546_v11  ;;  %v556_v51 = vor.u32 1.1754944e-38, %v555_v27  ;;  %v531_v35 = vmul.f32 %v1307_v38, %v1878_v58  ;;  %v664_v52 = vsel %vm1944_vm0, %v1864_v44, %v660_v41  ;;  %vm551_vm4 = vmor %vm549_vm11, %vm550_vm2 }
 0x1d7   : > { %v539_v50 = vand.u32 2147483647, %v1878_v58  ;;  %v541_v43 = vand.u32 2147483648, %v1878_v58  ;;  %v818_v30 = vperm.slane %v810_v53, %v1650_v17  ;;  %v806_v4 = vperm.slane %v798_v39, %v1650_v17 }
 0x1d8   : > { %v548_v36 = vadd.f32 %v1305_v56, %v547_v34  ;;  %v532_v62 = vsub.f32 1.0, %v531_v35  ;;  %v1373_v5 = vmov 1934713408   ;;  %v692_v60 = vsel %vm1959_vm3, %v1880_v45, %v688_v12 }
 0x1d9   : > { %v824_v44 = vunpack.c.l.s4 %v1373_v5  ;;  %vm536_vm5 = vweird.f32 %v1307_v38  ;;  %v855_v63 = vrot.slane %v818_v30, 4  ;;  %v796_v10 = vsel %vm771_vm14, %v795_v33, %v762_v24 }
 0x1da   : > { %v552_v2 = vsel %vm551_vm4, %v1305_v56, %v548_v36  ;;  %v533_v3 = vmul.f32 %v1307_v38, %v532_v62  ;;  %v802_v6 = vperm.slane %v796_v10, %v1650_v17  ;;  %v808_v21 = vsel %vm771_vm14, %v807_v20, %v1830_v7 }
 0x1db   : > { %v668_v47 = vor.u32 1.1754944e-38, %v667_v59  ;;  %vm694_vm6 = vcmp.eq.f32.partialorder %v693_v25, 8.507059e+37  ;;  %v557_v45 = vsel %vm1933_vm15, %v556_v51, %v552_v2  ;;  %vm535_vm7 = vweird.f32 %v1878_v58 }
 0x1dc   : > { %v753_v18 = vsel %vm1918_vm9, %v1886_v54, %v748_v1  ;;  %v697_v29 = vsel %vm694_vm6, %v696_v28, %v692_v60  ;;  %v534_v33 = vadd.f32 %v1307_v38, %v533_v3  ;;  %v1981_v24 = vunpack.c.0.s8 %v824_v44  ;;  %vm537_vm8 = vmor %vm535_vm7, %vm536_vm5 }
 0x1dd   : > { %v669_v56 = vsel %vm1928_vm12, %v668_v47, %v664_v52  ;;  %v542_v7 = vor.u32 1.1754944e-38, %v541_v43  ;;  %v856_v59 = vsel %vm771_vm14, %v855_v63, %v806_v4  ;;  %v814_v20 = vperm.slane %v808_v21, %v1650_v17 }
 0x1de   : > { %v755_v58 = vmul.f32 %v1631_v15, %v557_v45  ;;  %v538_v25 = vsel %vm537_vm8, %v1307_v38, %v534_v33  ;;  %vm540_vm10 = vcmp.eq.f32.partialorder %v539_v50, 8.507059e+37  ;;  %v845_v26 = vrot.slane %v802_v6, 4 }
 0x1df   : > { %v769_v54 = vmul.f32 %v1619_v9, %v753_v18  ;;  %v765_v27 = vmul.f32 %v1621_v61, %v697_v29  ;;  %v543_v49 = vsel %vm540_vm10, %v542_v7, %v538_v25  ;;  %v857_v0 = vrot.slane %v806_v4, 4 }
 0x1e0   : > { %v1992_v41 = vmul.f32 %v1617_v55, %v669_v56  ;;  %v754_v28 = vmul.f32 %v1629_v13, %v543_v49  ;;  %v862_v1 = vperm.slane %v856_v59, %v1981_v24  ;;  %v819_v37 = vrot.slane %v1707_v57, 4 }
 0x1e1   : > { %v895_v15 = vrot.slane %v1780_v40, 4  ;;  %v883_v11 = vrot.slane %v1867_v19, 4  ;;  %v907_v16 = vrot.slane %v1903_v8, 4  ;;  %v843_v9 = vrot.slane %v814_v20, 4 }
 0x1e2   : > { %v885_v38 = vrot.slane %v755_v58, 4  ;;  %v773_v61 = vrot.slane %v754_v28, 4  ;;  %v772_v55 = vsel %vm771_vm14, %v770_v14, %v754_v28  ;;  %v846_v12 = vsel %vm771_vm14, %v814_v20, %v845_v26 }
 0x1e3   : > { %v919_v13 = vrot.slane %v769_v54, 4  ;;  %v921_v39 = vrot.slane %v765_v27, 4  ;;  %v778_v53 = vperm.slane %v772_v55, %v1650_v17  ;;  %v858_v42 = vsel %vm771_vm14, %v818_v30, %v857_v0 }
 0x1e4   : > { %v909_v34 = vrot.slane %v1992_v41, 4  ;;  %v774_v51 = vsel %vm771_vm14, %v1702_v46, %v773_v61  ;;  %v875_v35 = vrot.slane %v862_v1, 4  ;;  %v898_v52 = vsel %vm771_vm14, %v1780_v40, %v897_v31 }
 0x1e5   : > { %v782_v14 = vperm.slane %v774_v51, %v1650_v17  ;;  %v821_v50 = vrot.slane %v778_v53, 4  ;;  %v854_v43 = vperm.slane %v846_v12, %v1981_v24  ;;  %v884_v22 = vsel %vm771_vm14, %v883_v11, %v755_v58 }
 0x1e6   : > { %v2017_v30 = vperm.slane %v858_v42, %v1981_v24  ;;  %v844_v36 = vsel %vm771_vm14, %v843_v9, %v802_v6  ;;  %v886_v46 = vsel %vm771_vm14, %v1867_v19, %v885_v38  ;;  %v896_v62 = vsel %vm771_vm14, %v895_v15, %v1663_v23 }
 0x1e7   : > { %v832_v31 = vsel %vm771_vm14, %v831_v48, %v782_v14  ;;  %v822_v40 = vsel %vm771_vm14, %v1707_v57, %v821_v50  ;;  %v2030_v4 = vperm.slane %v898_v52, %v1650_v17  ;;  %v922_v5 = vsel %vm771_vm14, %v769_v54, %v921_v39 }
 0x1e8   : > { %v838_v44 = vperm.slane %v832_v31, %v1981_v24  ;;  %v830_v60 = vperm.slane %v822_v40, %v1981_v24  ;;  %v890_v19 = vperm.slane %v884_v22, %v1650_v17  ;;  %v908_v23 = vsel %vm771_vm14, %v907_v16, %v1992_v41 }
 0x1e9   : > { %v833_v63 = vrot.slane %v782_v14, 4  ;;  %v820_v48 = vsel %vm771_vm14, %v819_v37, %v778_v53  ;;  %v902_v10 = vperm.slane %v896_v62, %v1650_v17  ;;  %v920_v57 = vsel %vm771_vm14, %v919_v13, %v765_v27 }
 0x1ea   : > { %v876_v2 = vsel %vm771_vm14, %v875_v35, %v838_v44  ;;  %v877_v3 = vrot.slane %v838_v44, 4  ;;  %v873_v6 = vrot.slane %v830_v60, 4  ;;  %v850_v21 = vperm.slane %v844_v36, %v1981_v24 }
 0x1eb   : > { %1008 = vrot.lane.b32.xlu1 %v876_v2, %s1374_s23  ;;  %v2045_v47 = vperm.slane %v886_v46, %v1650_v17  ;;  %v2048_v45 = vperm.slane %v922_v5, %v1650_v17  ;;  %v943_v18 = vrot.slane %v2030_v4, 4  ;;  %v926_v29 = vperm.slane %v920_v57, %v1650_v17 }
 0x1ec   : > { %v878_v33 = vsel %vm771_vm14, %v862_v1, %v877_v3  ;;  %v874_v56 = vsel %vm771_vm14, %v854_v43, %v873_v6  ;;  %v826_v7 = vperm.slane %v820_v48, %v1981_v24  ;;  %v914_v59 = vperm.slane %v908_v23, %v1650_v17 }
 0x1ed   : > { %1012 = vrot.lane.b32.xlu2 %v878_v33, %s1375_s24  ;;  %1004 = vrot.lane.b32.xlu0 %v874_v56, %s1376_s25  ;;  %v834_v20 = vsel %vm771_vm14, %v1671_v32, %v833_v63  ;;  %v933_v58 = vrot.slane %v890_v19, 4  ;;  %v931_v25 = vrot.slane %v902_v10, 4  ;;  %v955_v26 = vrot.slane %v926_v29, 4 }
 0x1ee   : > { %v871_v54 = vrot.slane %v854_v43, 4  ;;  %v910_v27 = vsel %vm771_vm14, %v1903_v8, %v909_v34  ;;  %v867_v49 = vrot.slane %v850_v21, 4  ;;  %v944_v0 = vsel %vm771_vm14, %v943_v18, %v2045_v47 }
 0x1ef   : > { %v932_v41 = vsel %vm771_vm14, %v931_v25, %v890_v19  ;;  %v956_v28 = vsel %vm771_vm14, %v955_v26, %v914_v59  ;;  %v842_v1 = vperm.slane %v834_v20, %v1981_v24  ;;  %v869_v37 = vrot.slane %v826_v7, 4 }
 0x1f0   : > { %v938_v32 = vperm.slane %v932_v41, %v1981_v24  ;;  %v962_v15 = vperm.slane %v956_v28, %v1981_v24  ;;  %v879_v11 = vrot.slane %v2017_v30, 4  ;;  %v967_v16 = vrot.slane %v2048_v45, 4 }
 0x1f1   : > { %v934_v8 = vsel %vm771_vm14, %v902_v10, %v933_v58  ;;  %v872_v9 = vsel %vm771_vm14, %v871_v54, %v830_v60  ;;  %v950_v38 = vperm.slane %v944_v0, %v1981_v24  ;;  %v868_v55 = vsel %vm771_vm14, %v867_v49, %v826_v7 }
 0x1f2   : > { %v979_v61 = vrot.slane %v962_v15, 4  ;;  %v918_v12 = vperm.slane %v910_v27, %v1650_v17  ;;  %v957_v13 = vrot.slane %v914_v59, 4  ;;  %v880_v39 = vsel %vm771_vm14, %v879_v11, %v842_v1 }
 0x1f3   : > { %1000 = vrot.lane.b32.xlu1 %v872_v9, %s1377_s26  ;;  %v870_v53 = vsel %vm771_vm14, %v850_v21, %v869_v37  ;;  %v942_v42 = vperm.slane %v934_v8, %v1981_v24  ;;  %v989_v35 = vrot.slane %v950_v38, 4  ;;  %v981_v50 = vrot.slane %v938_v32, 4 }
 0x1f4   : > { %v980_v34 = vsel %vm771_vm14, %v979_v61, %v938_v32  ;;  %v968_v51 = vsel %vm771_vm14, %v967_v16, %v918_v12  ;;  %v958_v52 = vsel %vm771_vm14, %v926_v29, %v957_v13  ;;  %v945_v62 = vrot.slane %v2045_v47, 4 }
 0x1f5   : > { %1016 = vrot.lane.b32.xlu0 %v880_v39, %s1378_s27  ;;  %996 = vrot.lane.b32.xlu2 %v870_v53, %s1379_s28  ;;  %v974_v17 = vperm.slane %v968_v51, %v1981_v24  ;;  %v985_v14 = vrot.slane %v942_v42, 4  ;;  %v966_v22 = vperm.slane %v958_v52, %v1981_v24  ;;  %v982_v46 = vsel %vm771_vm14, %v962_v15, %v981_v50 }
 0x1f6   : > { %v881_v31 = vrot.slane %v842_v1, 4  ;;  %v969_v40 = vrot.slane %v918_v12, 4  ;;  %v946_v5 = vsel %vm771_vm14, %v2030_v4, %v945_v62  ;;  %vm1052_vm9 = vcmask 261120  }
 0x1f7   : > { %v990_v43 = vsel %vm771_vm14, %v974_v17, %v989_v35  ;;  %v986_v36 = vsel %vm771_vm14, %v966_v22, %v985_v14  ;;  %v983_v60 = vrot.slane %v966_v22, 4  ;;  %v987_v19 = vrot.slane %v974_v17, 4 }
 0x1f8   : > { %v882_v44 = vsel %vm771_vm14, %v2017_v30, %v881_v31  ;;  %v970_v23 = vsel %vm771_vm14, %v2048_v45, %v969_v40  ;;  %v954_v10 = vperm.slane %v946_v5, %v1981_v24  ;;  %vm1054_vm11 = vcmask 392192  }
 0x1f9   : > { %v984_v63 = vsel %vm771_vm14, %v983_v60, %v942_v42  ;;  %v988_v48 = vsel %vm771_vm14, %v987_v19, %v950_v38  ;;  %v978_v4 = vperm.slane %v970_v23, %v1981_v24  ;;  %vm1058_vm12 = vcmask 654336  }
 0x1fa   : > { %v993_v30 = vrot.slane %v954_v10, 4  ;;  %vm1060_vm13 = vcmask 785408   ;;  %vm1062_vm15 = vcmask 916480  }
 0x1fb   : > { %1040 = vrot.lane.b32.xlu1 %v990_v43, %s1375_s24  ;;  %v991_v57 = vrot.slane %v978_v4, 4 }
 0x1fc   : > { %v994_v3 = vsel %vm771_vm14, %v978_v4, %v993_v30 }
 0x1fd   : > { %1032 = vrot.lane.b32.xlu2 %v986_v36, %s1376_s25  ;;  %1024 = vrot.lane.b32.xlu0 %v982_v46, %s1379_s28  ;;  %v992_v2 = vsel %vm771_vm14, %v991_v57, %v954_v10  ;;  %vm1056_vm14 = vcmask 523264  }
 0x203   : > { %1020 = vrot.lane.b32.xlu1 %v882_v44, %s1380_s29 }
 0x205   : > { %1028 = vrot.lane.b32.xlu2 %v984_v63, %s1377_s26  ;;  %1036 = vrot.lane.b32.xlu0 %v988_v48, %s1374_s23  ;;  %s1328_s23 = scalar_lea.hbm %s2158_s1, 32 }
 0x206   : > { %p1330_p1 = scmp.lt.s32.totalorder %s1328_s23, %s1324_s20 }
 0x208   : > { %p1331_p2 = por %p1330_p1, %p1329_p0 }
 0x20a   : > { %p1332_p3 = pnand %p1331_p2, %p1327_p13 }
 0x20d   : > { %1044 = vrot.lane.b32.xlu2 %v992_v2, %s1378_s27  ;;  %1048 = vrot.lane.b32.xlu0 %v994_v3, %s1380_s29 }
 0x247   : > { %v1013_v6 = vpop.permute.xlu2 %1012 }
 0x24f   : > { %v997_v45 = vpop.permute.xlu2 %996 }
 0x250   : > { %v1051_v24 = vsel %vm385_vm1, %v868_v55, %v997_v45 }
 0x257   : > { %v1033_v56 = vpop.permute.xlu2 %1032 }
 0x25d   : > { %v1009_v21 = vpop.permute.xlu1 %1008 }
 0x25f   : > { %v1005_v47 = vpop.permute.xlu0 %1004  ;;  %v1029_v54 = vpop.permute.xlu2 %1028 }
 0x265   : > { %v1001_v18 = vpop.permute.xlu1 %1000 }
 0x266   : > { %v1053_v33 = vsel %vm1052_vm9, %v1051_v24, %v1001_v18 }
 0x267   : > { %v1017_v29 = vpop.permute.xlu0 %1016  ;;  %v1055_v7 = vsel %vm1054_vm11, %v1053_v33, %v1005_v47  ;;  %v1045_v15 = vpop.permute.xlu2 %1044 }
 0x268   : > { %v1057_v20 = vsel %vm1056_vm14, %v1055_v7, %v1009_v21 }
 0x269   : > { %v1059_v25 = vsel %vm1058_vm12, %v1057_v20, %v1013_v6 }
 0x26a   : > { %v1061_v27 = vsel %vm1060_vm13, %v1059_v25, %v1017_v29 }
 0x26d   : > { %v1041_v59 = vpop.permute.xlu1 %1040 }
 0x26f   : > { %v1025_v58 = vpop.permute.xlu0 %1024 }
 0x270   : > { %v1064_v26 = vsel %vm385_vm1, %v980_v34, %v1025_v58 }
 0x271   : > { %v1065_v49 = vsel %vm1052_vm9, %v1064_v26, %v1029_v54 }
 0x272   : > { %v1066_v1 = vsel %vm1054_vm11, %v1065_v49, %v1033_v56 }
 0x275   : > { %v1021_v0 = vpop.permute.xlu1 %1020 }
 0x276   : > { %v1063_v41 = vsel %vm1062_vm15, %v1061_v27, %v1021_v0 }
 0x277   : > { %1071 = vst [vmem:[%s112_s4] sm:$0xff] %v1063_v41  ;;  %v1037_v28 = vpop.permute.xlu0 %1036 }
 0x278   : > { %v1067_v37 = vsel %vm1056_vm14, %v1066_v1, %v1037_v28 }
 0x279   : > { %v1068_v32 = vsel %vm1058_vm12, %v1067_v37, %v1041_v59 }
 0x27a   : > { %v1069_v16 = vsel %vm1060_vm13, %v1068_v32, %v1045_v15 }
 0x27f   : > { %v1049_v11 = vpop.permute.xlu0 %1048 }
 0x280   : > { %v1070_v8 = vsel %vm1062_vm15, %v1069_v16, %v1049_v11 }
 0x281   : > { %1072 = vst [vmem:[%s112_s4 + $0x8] sm:$0xff] %v1070_v8 }
 0x282   : > { %1335 = shalt.err (!%p1332_p3)
}
 0x283   : > { %1196 = dma.vmem_to_hbm [thread:$0]  (%p1429_p5), %s1088_s14, 256, %s1090_s18, %s1074_s10  }
 0x284 PF: > { %p1202_p4 = scmp.ge.s32.totalorder %s1370_s9, 2  ;;  %s1101_s26 = sand.u32 1, %s1358_s6  }
 0x285   : > { %s1102_s27 = scalar_lea.sflag [#allocation3], %s1101_s26 }
 0x286   : > { %p1199_p7 = pnand %p1202_p4, %p1433_p6 }
 0x288   : > { %p1200_p8 = pneg %p1199_p7 }
 0x28a   : > { %1353 = dma.done.wait (%p1200_p8), %s1102_s27, 256  }
 0x28b   : > { %1355 = vsyncadd (%p1200_p8), %s1102_s27, 4294967040  ;;  %p11_p9 = scmp.ge.s32.totalorder %s1416_s12, 4   ;;  %s2197_s6 = smov %s1362_s7 }
 0x28c   : > { %s2198_s7 = smov %s1366_s8  ;;  %s2199_s8 = smov %s1427_s15 }
 0x28d   : > { %s2200_s9 = smov %s1416_s12  ;;  %13 = sbr.rel (!%p11_p9) target bundleno = 3 (0x3), region = 59 }
 0x292   :  { %1108 = vsyncpa [#allocation3], 1 }
 0x293   :  { %1110 = vsyncpa [#allocation3 + $0x1], 1 }

</bundles_post_ra>
